<compile_context>
chip_gen: v7x
topology: tpu7x:2x2x1
jax: 0.10.0
libtpu: 0.0.40
codegen_flags: <defaults>
</compile_context>

<pallas_src>
import jax
import jax.numpy as jnp
from jax.experimental import pallas as pl
from jax.experimental.pallas import tpu as pltpu

C_LANES = 128            # conv output channels are zero-padded to this lane width
DEFAULT_L_TILE = 2048    # conv rows per grid step (multiple of 32)
VMEM_LIMIT = 32 * 1024 * 1024


def _choose_l_tile(l_out, target):
    """Conv-row tile size.  Must be a multiple of 4 (pool windows may not
    straddle tiles); if more than one tile is needed it must also be a multiple
    of 32 so the pooled (L_TILE//4)-row output blocks stay 8-sublane aligned."""
    target = max(32, (target // 32) * 32)
    if l_out <= target:
        return ((l_out + 3) // 4) * 4          # single tile, round up to mult of 4
    return target


# ----------------------------- Kernel 1 -------------------------------------
# Conv1d (valid, stride 1) as K shifted-slice matmuls (f32 accumulation),
# per-pool-window max/min of the raw conv output, and per-(sample, tile)
# BatchNorm sum / sum-of-squares partials.
def _make_conv_pool_stats_kernel(k, l_out, l_tile, needs_mask):
    lp_tile = l_tile // 4

    def kernel(x_ref, w_ref, pmax_ref, pmin_ref, stat_ref):
        # x_ref:    (1, L_x_pad, C_in)   full (zero-padded) per-sample input
        # w_ref:    (K, C_in, C_PAD)     lane-padded weights (resident)
        # pmax_ref: (1, LP_TILE, C_PAD)  per-pool-window max of raw conv
        # pmin_ref: (1, LP_TILE, C_PAD)  per-pool-window min of raw conv
        # stat_ref: (1, 1, 2, C_PAD)     per-(sample, tile) [sum; sum_sq]
        l = pl.program_id(1)
        c_pad = pmax_ref.shape[2]
        base = l * l_tile

        # Conv as K shifted slices of x times (C_in, C_PAD) weight slabs.
        acc = jnp.dot(x_ref[0, pl.ds(base, l_tile), :], w_ref[0],
                      preferred_element_type=jnp.float32)
        for kk in range(1, k):
            acc = acc + jnp.dot(x_ref[0, pl.ds(base + kk, l_tile), :], w_ref[kk],
                                preferred_element_type=jnp.float32)

        # BatchNorm batch-statistic partials; mask off rows past L_out that
        # only exist because of tile padding.
        if needs_mask:
            rows = base + jax.lax.broadcasted_iota(jnp.int32, (l_tile, 1), 0)
            yv = jnp.where(rows < l_out, acc, 0.0)
        else:
            yv = acc
        stat_ref[0, 0, 0:1, :] = jnp.sum(yv, axis=0, keepdims=True)
        stat_ref[0, 0, 1:2, :] = jnp.sum(yv * yv, axis=0, keepdims=True)

        # MaxPool1d(4,4) windows of the RAW conv tile: keep both max and min so
        # the BN affine (applied in kernel 2) is exact for negative gamma.
        y4 = acc.reshape(lp_tile, 4, c_pad)
        pmax_ref[0] = jnp.max(y4, axis=1)
        pmin_ref[0] = jnp.min(y4, axis=1)

    return kernel


# ----------------------------- Kernel 2 -------------------------------------
# BN affine + extremum-select + ReLU on the already-pooled lane-dense tiles.
def bn_select_relu_kernel(pmax_ref, pmin_ref, s_ref, b_ref, o_ref):
    # pmax/pmin: (1, LP_TILE, C_PAD); s_ref/b_ref: (1, C_PAD); o: (1, LP_TILE, C_PAD)
    scale = s_ref[...]
    shift = b_ref[...]
    zmax = pmax_ref[0] * scale + shift
    zmin = pmin_ref[0] * scale + shift
    z = jnp.where(scale >= 0.0, zmax, zmin)   # = max over window of BN(conv)
    o_ref[0] = jnp.maximum(z, 0.0)            # ReLU
    # TODO(synk): optionally transpose in-kernel and emit NCL (C_out-row) blocks
    # to shave the final 128-lane store + wrapper transpose.


# ----------------------------- Wrapper --------------------------------------
def basic_block_forward(x, w, gamma, beta, eps=1e-5, l_tile_target=DEFAULT_L_TILE):
    """x: (N, C_in, L) f32; w: (C_out, C_in, K); returns (N, C_out, L_pool)."""
    N, C_in, L = x.shape
    C_out, _, K = w.shape
    L_out = L - K + 1
    L_pool = L_out // 4
    C_PAD = ((C_out + C_LANES - 1) // C_LANES) * C_LANES

    L_TILE = _choose_l_tile(L_out, l_tile_target)
    n_l = -(-L_out // L_TILE)
    LP_TILE = L_TILE // 4
    L_pool_pad = n_l * LP_TILE
    L_x_pad = n_l * L_TILE + K - 1
    needs_mask = (n_l * L_TILE != L_out)

    # Lane-dense layout: channels on lanes, sequence on sublanes; zero-pad L so
    # every in-kernel shifted read stays in bounds.
    x_nlc = jnp.transpose(x, (0, 2, 1))                        # (N, L, C_in)
    if L_x_pad > L:
        x_nlc = jnp.pad(x_nlc, ((0, 0), (0, L_x_pad - L), (0, 0)))

    # Weights as (K, C_in, C_PAD); output channels zero-padded to 128 lanes.
    w_kic = jnp.transpose(w, (2, 1, 0)).astype(jnp.float32)    # (K, C_in, C_out)
    w_pad = jnp.zeros((K, C_in, C_PAD), jnp.float32).at[:, :, :C_out].set(w_kic)

    kernel1 = _make_conv_pool_stats_kernel(K, L_out, L_TILE, needs_mask)
    pmax, pmin, stats = pl.pallas_call(
        kernel1,
        grid=(N, n_l),
        in_specs=[
            pl.BlockSpec((1, L_x_pad, C_in), lambda n, l: (n, 0, 0)),   # per-sample
            pl.BlockSpec((K, C_in, C_PAD), lambda n, l: (0, 0, 0)),     # resident
        ],
        out_specs=[
            pl.BlockSpec((1, LP_TILE, C_PAD), lambda n, l: (n, l, 0)),
            pl.BlockSpec((1, LP_TILE, C_PAD), lambda n, l: (n, l, 0)),
            pl.BlockSpec((1, 1, 2, C_PAD), lambda n, l: (n, l, 0, 0)),
        ],
        out_shape=(
            jax.ShapeDtypeStruct((N, L_pool_pad, C_PAD), jnp.float32),
            jax.ShapeDtypeStruct((N, L_pool_pad, C_PAD), jnp.float32),
            jax.ShapeDtypeStruct((N, n_l, 2, C_PAD), jnp.float32),
        ),
        compiler_params=pltpu.CompilerParams(
            dimension_semantics=("parallel", "parallel"),
            vmem_limit_bytes=VMEM_LIMIT,
        ),
    )(x_nlc, w_pad)

    # Tiny glue: reduce partials -> per-channel BN scale/shift (train-mode BN,
    # biased variance).  Padded channels have sum=sumsq=0 -> scale=shift=0.
    tot = jnp.sum(stats, axis=(0, 1))                         # (2, C_PAD)
    cnt = jnp.float32(N * L_out)
    mean = tot[0] / cnt
    var = jnp.maximum(tot[1] / cnt - mean * mean, 0.0)
    gamma_pad = jnp.zeros((C_PAD,), jnp.float32).at[:C_out].set(gamma)
    beta_pad = jnp.zeros((C_PAD,), jnp.float32).at[:C_out].set(beta)
    scale = gamma_pad / jnp.sqrt(var + eps)
    shift = beta_pad - mean * scale

    out_pad = pl.pallas_call(
        bn_select_relu_kernel,
        grid=(N, n_l),
        in_specs=[
            pl.BlockSpec((1, LP_TILE, C_PAD), lambda n, p: (n, p, 0)),
            pl.BlockSpec((1, LP_TILE, C_PAD), lambda n, p: (n, p, 0)),
            pl.BlockSpec((1, C_PAD), lambda n, p: (0, 0)),
            pl.BlockSpec((1, C_PAD), lambda n, p: (0, 0)),
        ],
        out_specs=pl.BlockSpec((1, LP_TILE, C_PAD), lambda n, p: (n, p, 0)),
        out_shape=jax.ShapeDtypeStruct((N, L_pool_pad, C_PAD), jnp.float32),
        compiler_params=pltpu.CompilerParams(
            dimension_semantics=("parallel", "parallel"),
            vmem_limit_bytes=VMEM_LIMIT,
        ),
    )(pmax, pmin, scale[None, :], shift[None, :])

    out = out_pad[:, :L_pool, :C_out]         # drop pool-tail / channel padding
    return jnp.transpose(out, (0, 2, 1))      # back to NCL


# ----------------------------- Pure-JAX reference ----------------------------
def reference_forward(x, w, gamma, beta, eps=1e-5):
    y = jax.lax.conv_general_dilated(
        x, w, window_strides=(1,), padding="VALID",
        dimension_numbers=("NCH", "OIH", "NCH"))
    mean = jnp.mean(y, axis=(0, 2), keepdims=True)
    var = jnp.mean((y - mean) ** 2, axis=(0, 2), keepdims=True)
    yb = (y - mean) / jnp.sqrt(var + eps) * gamma[None, :, None] + beta[None, :, None]
    N, C_out, L_out = yb.shape
    L_pool = L_out // 4
    yp = jnp.max(yb[:, :, : L_pool * 4].reshape(N, C_out, L_pool, 4), axis=-1)
    return jnp.maximum(yp, 0.0)


if __name__ == "__main__":
    key = jax.random.PRNGKey(0)
    kx, kw, kg, kb, kx2, kw2 = jax.random.split(key, 6)
    K = 9

    # Case 1: small shape, default BatchNorm init (gamma=1, beta=0), one l-tile.
    N, C_in, C_out, L = 2, 4, 8, 24                  # L_out=16, L_pool=4
    x = jax.random.normal(kx, (N, C_in, L), dtype=jnp.float32)
    w = jax.random.normal(kw, (C_out, C_in, K), dtype=jnp.float32) * 0.1
    gamma = jnp.ones((C_out,), jnp.float32)
    beta = jnp.zeros((C_out,), jnp.float32)
    out = jax.block_until_ready(basic_block_forward(x, w, gamma, beta))
    ref = jax.block_until_ready(reference_forward(x, w, gamma, beta))
    assert out.shape == ref.shape, (out.shape, ref.shape)
    assert jnp.allclose(out, ref, rtol=1e-3, atol=1e-3), \
        float(jnp.max(jnp.abs(out - ref)))

    # Case 2: mixed-sign gamma (exercises the negative-scale/min path) and a
    # small tile target that forces multiple l-tiles + tail masking.
    N2, C_in2, C_out2, L2 = 2, 4, 8, 64              # L_out=56, L_pool=14
    x2 = jax.random.normal(kx2, (N2, C_in2, L2), dtype=jnp.float32)
    w2 = jax.random.normal(kw2, (C_out2, C_in2, K), dtype=jnp.float32) * 0.1
    gamma2 = jax.random.normal(kg, (C_out2,), dtype=jnp.float32)
    beta2 = jax.random.normal(kb, (C_out2,), dtype=jnp.float32) * 0.1
    out2 = jax.block_until_ready(
        basic_block_forward(x2, w2, gamma2, beta2, l_tile_target=32))
    ref2 = jax.block_until_ready(reference_forward(x2, w2, gamma2, beta2))
    assert out2.shape == ref2.shape, (out2.shape, ref2.shape)
    assert jnp.allclose(out2, ref2, rtol=1e-3, atol=1e-3), \
        float(jnp.max(jnp.abs(out2 - ref2)))

    print("KERNEL_OK")
</pallas_src>

<mosaic_0001>
module attributes {stable_mosaic.version = 11 : i64} {
  func.func @kernel(%arg0: i32, %arg1: i32, %arg2: memref<1x24x4xf32, #tpu.memory_space<vmem>>, %arg3: memref<9x4x128xf32, #tpu.memory_space<vmem>>, %arg4: memref<1x4x128xf32, #tpu.memory_space<vmem>>, %arg5: memref<1x4x128xf32, #tpu.memory_space<vmem>>, %arg6: memref<1x1x2x128xf32, #tpu.memory_space<vmem>>) attributes {dimension_semantics = [#tpu.dimension_semantics<parallel>, #tpu.dimension_semantics<parallel>], iteration_bounds = array<i64: 2, 1>, scalar_prefetch = 0 : i64, scratch_operands = 0 : i64, tpu.core_type = #tpu.core_type<tc>, window_params = [{transform_indices = @transform_0, window_bounds = array<i64: 1, 24, 4>}, {pipeline_mode = #tpu.pipeline_mode<synchronous>, transform_indices = @transform_1, window_bounds = array<i64: 9, 4, 128>}, {transform_indices = @transform_2, window_bounds = array<i64: 1, 4, 128>}, {transform_indices = @transform_3, window_bounds = array<i64: 1, 4, 128>}, {transform_indices = @transform_4, window_bounds = array<i64: 1, 1, 2, 128>}]} {
    %c16_i32 = arith.constant 16 : i32
    %0 = arith.muli %arg1, %c16_i32 : i32
    %c0 = arith.constant 0 : index
    %1 = arith.index_cast %0 : i32 to index
    %c0_0 = arith.constant 0 : index
    %2 = vector.load %arg2[%c0, %1, %c0_0] : memref<1x24x4xf32, #tpu.memory_space<vmem>>, vector<1x16x4xf32>
    %3 = vector.shape_cast %2 : vector<1x16x4xf32> to vector<16x4xf32>
    %c0_1 = arith.constant 0 : index
    %c0_2 = arith.constant 0 : index
    %c0_3 = arith.constant 0 : index
    %4 = vector.load %arg3[%c0_1, %c0_2, %c0_3] : memref<9x4x128xf32, #tpu.memory_space<vmem>>, vector<1x4x128xf32>
    %5 = vector.shape_cast %4 : vector<1x4x128xf32> to vector<4x128xf32>
    %cst = arith.constant dense<0.000000e+00> : vector<16x128xf32>
    %6 = tpu.matmul %3, %5, %cst {dimension_numbers = #tpu.dot_dimension_numbers<[1], [0], [0], [1], [0, 0, 1, 1], [], []>} : vector<16x4xf32>, vector<4x128xf32>, vector<16x128xf32> -> vector<16x128xf32>
    %c1_i32 = arith.constant 1 : i32
    %7 = arith.addi %0, %c1_i32 : i32
    %c0_4 = arith.constant 0 : index
    %8 = arith.index_cast %7 : i32 to index
    %c0_5 = arith.constant 0 : index
    %9 = vector.load %arg2[%c0_4, %8, %c0_5] : memref<1x24x4xf32, #tpu.memory_space<vmem>>, vector<1x16x4xf32>
    %10 = vector.shape_cast %9 : vector<1x16x4xf32> to vector<16x4xf32>
    %c1 = arith.constant 1 : index
    %c0_6 = arith.constant 0 : index
    %c0_7 = arith.constant 0 : index
    %11 = vector.load %arg3[%c1, %c0_6, %c0_7] : memref<9x4x128xf32, #tpu.memory_space<vmem>>, vector<1x4x128xf32>
    %12 = vector.shape_cast %11 : vector<1x4x128xf32> to vector<4x128xf32>
    %cst_8 = arith.constant dense<0.000000e+00> : vector<16x128xf32>
    %13 = tpu.matmul %10, %12, %cst_8 {dimension_numbers = #tpu.dot_dimension_numbers<[1], [0], [0], [1], [0, 0, 1, 1], [], []>} : vector<16x4xf32>, vector<4x128xf32>, vector<16x128xf32> -> vector<16x128xf32>
    %14 = arith.addf %6, %13 : vector<16x128xf32>
    %c2_i32 = arith.constant 2 : i32
    %15 = arith.addi %0, %c2_i32 : i32
    %c0_9 = arith.constant 0 : index
    %16 = arith.index_cast %15 : i32 to index
    %c0_10 = arith.constant 0 : index
    %17 = vector.load %arg2[%c0_9, %16, %c0_10] : memref<1x24x4xf32, #tpu.memory_space<vmem>>, vector<1x16x4xf32>
    %18 = vector.shape_cast %17 : vector<1x16x4xf32> to vector<16x4xf32>
    %c2 = arith.constant 2 : index
    %c0_11 = arith.constant 0 : index
    %c0_12 = arith.constant 0 : index
    %19 = vector.load %arg3[%c2, %c0_11, %c0_12] : memref<9x4x128xf32, #tpu.memory_space<vmem>>, vector<1x4x128xf32>
    %20 = vector.shape_cast %19 : vector<1x4x128xf32> to vector<4x128xf32>
    %cst_13 = arith.constant dense<0.000000e+00> : vector<16x128xf32>
    %21 = tpu.matmul %18, %20, %cst_13 {dimension_numbers = #tpu.dot_dimension_numbers<[1], [0], [0], [1], [0, 0, 1, 1], [], []>} : vector<16x4xf32>, vector<4x128xf32>, vector<16x128xf32> -> vector<16x128xf32>
    %22 = arith.addf %14, %21 : vector<16x128xf32>
    %c3_i32 = arith.constant 3 : i32
    %23 = arith.addi %0, %c3_i32 : i32
    %c0_14 = arith.constant 0 : index
    %24 = arith.index_cast %23 : i32 to index
    %c0_15 = arith.constant 0 : index
    %25 = vector.load %arg2[%c0_14, %24, %c0_15] : memref<1x24x4xf32, #tpu.memory_space<vmem>>, vector<1x16x4xf32>
    %26 = vector.shape_cast %25 : vector<1x16x4xf32> to vector<16x4xf32>
    %c3 = arith.constant 3 : index
    %c0_16 = arith.constant 0 : index
    %c0_17 = arith.constant 0 : index
    %27 = vector.load %arg3[%c3, %c0_16, %c0_17] : memref<9x4x128xf32, #tpu.memory_space<vmem>>, vector<1x4x128xf32>
    %28 = vector.shape_cast %27 : vector<1x4x128xf32> to vector<4x128xf32>
    %cst_18 = arith.constant dense<0.000000e+00> : vector<16x128xf32>
    %29 = tpu.matmul %26, %28, %cst_18 {dimension_numbers = #tpu.dot_dimension_numbers<[1], [0], [0], [1], [0, 0, 1, 1], [], []>} : vector<16x4xf32>, vector<4x128xf32>, vector<16x128xf32> -> vector<16x128xf32>
    %30 = arith.addf %22, %29 : vector<16x128xf32>
    %c4_i32 = arith.constant 4 : i32
    %31 = arith.addi %0, %c4_i32 : i32
    %c0_19 = arith.constant 0 : index
    %32 = arith.index_cast %31 : i32 to index
    %c0_20 = arith.constant 0 : index
    %33 = vector.load %arg2[%c0_19, %32, %c0_20] : memref<1x24x4xf32, #tpu.memory_space<vmem>>, vector<1x16x4xf32>
    %34 = vector.shape_cast %33 : vector<1x16x4xf32> to vector<16x4xf32>
    %c4 = arith.constant 4 : index
    %c0_21 = arith.constant 0 : index
    %c0_22 = arith.constant 0 : index
    %35 = vector.load %arg3[%c4, %c0_21, %c0_22] : memref<9x4x128xf32, #tpu.memory_space<vmem>>, vector<1x4x128xf32>
    %36 = vector.shape_cast %35 : vector<1x4x128xf32> to vector<4x128xf32>
    %cst_23 = arith.constant dense<0.000000e+00> : vector<16x128xf32>
    %37 = tpu.matmul %34, %36, %cst_23 {dimension_numbers = #tpu.dot_dimension_numbers<[1], [0], [0], [1], [0, 0, 1, 1], [], []>} : vector<16x4xf32>, vector<4x128xf32>, vector<16x128xf32> -> vector<16x128xf32>
    %38 = arith.addf %30, %37 : vector<16x128xf32>
    %c5_i32 = arith.constant 5 : i32
    %39 = arith.addi %0, %c5_i32 : i32
    %c0_24 = arith.constant 0 : index
    %40 = arith.index_cast %39 : i32 to index
    %c0_25 = arith.constant 0 : index
    %41 = vector.load %arg2[%c0_24, %40, %c0_25] : memref<1x24x4xf32, #tpu.memory_space<vmem>>, vector<1x16x4xf32>
    %42 = vector.shape_cast %41 : vector<1x16x4xf32> to vector<16x4xf32>
    %c5 = arith.constant 5 : index
    %c0_26 = arith.constant 0 : index
    %c0_27 = arith.constant 0 : index
    %43 = vector.load %arg3[%c5, %c0_26, %c0_27] : memref<9x4x128xf32, #tpu.memory_space<vmem>>, vector<1x4x128xf32>
    %44 = vector.shape_cast %43 : vector<1x4x128xf32> to vector<4x128xf32>
    %cst_28 = arith.constant dense<0.000000e+00> : vector<16x128xf32>
    %45 = tpu.matmul %42, %44, %cst_28 {dimension_numbers = #tpu.dot_dimension_numbers<[1], [0], [0], [1], [0, 0, 1, 1], [], []>} : vector<16x4xf32>, vector<4x128xf32>, vector<16x128xf32> -> vector<16x128xf32>
    %46 = arith.addf %38, %45 : vector<16x128xf32>
    %c6_i32 = arith.constant 6 : i32
    %47 = arith.addi %0, %c6_i32 : i32
    %c0_29 = arith.constant 0 : index
    %48 = arith.index_cast %47 : i32 to index
    %c0_30 = arith.constant 0 : index
    %49 = vector.load %arg2[%c0_29, %48, %c0_30] : memref<1x24x4xf32, #tpu.memory_space<vmem>>, vector<1x16x4xf32>
    %50 = vector.shape_cast %49 : vector<1x16x4xf32> to vector<16x4xf32>
    %c6 = arith.constant 6 : index
    %c0_31 = arith.constant 0 : index
    %c0_32 = arith.constant 0 : index
    %51 = vector.load %arg3[%c6, %c0_31, %c0_32] : memref<9x4x128xf32, #tpu.memory_space<vmem>>, vector<1x4x128xf32>
    %52 = vector.shape_cast %51 : vector<1x4x128xf32> to vector<4x128xf32>
    %cst_33 = arith.constant dense<0.000000e+00> : vector<16x128xf32>
    %53 = tpu.matmul %50, %52, %cst_33 {dimension_numbers = #tpu.dot_dimension_numbers<[1], [0], [0], [1], [0, 0, 1, 1], [], []>} : vector<16x4xf32>, vector<4x128xf32>, vector<16x128xf32> -> vector<16x128xf32>
    %54 = arith.addf %46, %53 : vector<16x128xf32>
    %c7_i32 = arith.constant 7 : i32
    %55 = arith.addi %0, %c7_i32 : i32
    %c0_34 = arith.constant 0 : index
    %56 = arith.index_cast %55 : i32 to index
    %c0_35 = arith.constant 0 : index
    %57 = vector.load %arg2[%c0_34, %56, %c0_35] : memref<1x24x4xf32, #tpu.memory_space<vmem>>, vector<1x16x4xf32>
    %58 = vector.shape_cast %57 : vector<1x16x4xf32> to vector<16x4xf32>
    %c7 = arith.constant 7 : index
    %c0_36 = arith.constant 0 : index
    %c0_37 = arith.constant 0 : index
    %59 = vector.load %arg3[%c7, %c0_36, %c0_37] : memref<9x4x128xf32, #tpu.memory_space<vmem>>, vector<1x4x128xf32>
    %60 = vector.shape_cast %59 : vector<1x4x128xf32> to vector<4x128xf32>
    %cst_38 = arith.constant dense<0.000000e+00> : vector<16x128xf32>
    %61 = tpu.matmul %58, %60, %cst_38 {dimension_numbers = #tpu.dot_dimension_numbers<[1], [0], [0], [1], [0, 0, 1, 1], [], []>} : vector<16x4xf32>, vector<4x128xf32>, vector<16x128xf32> -> vector<16x128xf32>
    %62 = arith.addf %54, %61 : vector<16x128xf32>
    %c8_i32 = arith.constant 8 : i32
    %63 = arith.addi %0, %c8_i32 : i32
    %c0_39 = arith.constant 0 : index
    %64 = arith.index_cast %63 : i32 to index
    %c0_40 = arith.constant 0 : index
    %65 = vector.load %arg2[%c0_39, %64, %c0_40] : memref<1x24x4xf32, #tpu.memory_space<vmem>>, vector<1x16x4xf32>
    %66 = vector.shape_cast %65 : vector<1x16x4xf32> to vector<16x4xf32>
    %c8 = arith.constant 8 : index
    %c0_41 = arith.constant 0 : index
    %c0_42 = arith.constant 0 : index
    %67 = vector.load %arg3[%c8, %c0_41, %c0_42] : memref<9x4x128xf32, #tpu.memory_space<vmem>>, vector<1x4x128xf32>
    %68 = vector.shape_cast %67 : vector<1x4x128xf32> to vector<4x128xf32>
    %cst_43 = arith.constant dense<0.000000e+00> : vector<16x128xf32>
    %69 = tpu.matmul %66, %68, %cst_43 {dimension_numbers = #tpu.dot_dimension_numbers<[1], [0], [0], [1], [0, 0, 1, 1], [], []>} : vector<16x4xf32>, vector<4x128xf32>, vector<16x128xf32> -> vector<16x128xf32>
    %70 = arith.addf %62, %69 : vector<16x128xf32>
    %cst_44 = arith.constant dense<0.000000e+00> : vector<128xf32>
    %71 = vector.multi_reduction <add>, %70, %cst_44 [0] : vector<16x128xf32> to vector<128xf32>
    %72 = vector.shape_cast %71 : vector<128xf32> to vector<1x128xf32>
    %c0_45 = arith.constant 0 : index
    %c0_46 = arith.constant 0 : index
    %c0_47 = arith.constant 0 : index
    %c0_48 = arith.constant 0 : index
    %73 = vector.load %arg6[%c0_45, %c0_46, %c0_47, %c0_48] : memref<1x1x2x128xf32, #tpu.memory_space<vmem>>, vector<1x1x1x128xf32>
    %74 = vector.shape_cast %73 : vector<1x1x1x128xf32> to vector<1x128xf32>
    %75 = vector.shape_cast %72 : vector<1x128xf32> to vector<1x1x1x128xf32>
    tpu.vector_store %arg6[%c0_45, %c0_46, %c0_47, %c0_48], %75 {strides = array<i32>} : memref<1x1x2x128xf32, #tpu.memory_space<vmem>>, vector<1x1x1x128xf32>,
    %76 = arith.mulf %70, %70 : vector<16x128xf32>
    %cst_49 = arith.constant dense<0.000000e+00> : vector<128xf32>
    %77 = vector.multi_reduction <add>, %76, %cst_49 [0] : vector<16x128xf32> to vector<128xf32>
    %78 = vector.shape_cast %77 : vector<128xf32> to vector<1x128xf32>
    %c0_50 = arith.constant 0 : index
    %c0_51 = arith.constant 0 : index
    %c1_52 = arith.constant 1 : index
    %c0_53 = arith.constant 0 : index
    %79 = vector.load %arg6[%c0_50, %c0_51, %c1_52, %c0_53] : memref<1x1x2x128xf32, #tpu.memory_space<vmem>>, vector<1x1x1x128xf32>
    %80 = vector.shape_cast %79 : vector<1x1x1x128xf32> to vector<1x128xf32>
    %81 = vector.shape_cast %78 : vector<1x128xf32> to vector<1x1x1x128xf32>
    tpu.vector_store %arg6[%c0_50, %c0_51, %c1_52, %c0_53], %81 {strides = array<i32>} : memref<1x1x2x128xf32, #tpu.memory_space<vmem>>, vector<1x1x1x128xf32>,
    %82 = vector.shape_cast %70 : vector<16x128xf32> to vector<4x4x128xf32>
    %cst_54 = arith.constant dense<0xFF800000> : vector<4x128xf32>
    %83 = vector.multi_reduction <maximumf>, %82, %cst_54 [1] : vector<4x4x128xf32> to vector<4x128xf32>
    %c0_55 = arith.constant 0 : index
    %c0_56 = arith.constant 0 : index
    %c0_57 = arith.constant 0 : index
    %84 = vector.load %arg4[%c0_55, %c0_56, %c0_57] : memref<1x4x128xf32, #tpu.memory_space<vmem>>, vector<1x4x128xf32>
    %85 = vector.shape_cast %84 : vector<1x4x128xf32> to vector<4x128xf32>
    %86 = vector.shape_cast %83 : vector<4x128xf32> to vector<1x4x128xf32>
    tpu.vector_store %arg4[%c0_55, %c0_56, %c0_57], %86 {strides = array<i32>} : memref<1x4x128xf32, #tpu.memory_space<vmem>>, vector<1x4x128xf32>,
    %cst_58 = arith.constant dense<0x7F800000> : vector<4x128xf32>
    %87 = vector.multi_reduction <minimumf>, %82, %cst_58 [1] : vector<4x4x128xf32> to vector<4x128xf32>
    %c0_59 = arith.constant 0 : index
    %c0_60 = arith.constant 0 : index
    %c0_61 = arith.constant 0 : index
    %88 = vector.load %arg5[%c0_59, %c0_60, %c0_61] : memref<1x4x128xf32, #tpu.memory_space<vmem>>, vector<1x4x128xf32>
    %89 = vector.shape_cast %88 : vector<1x4x128xf32> to vector<4x128xf32>
    %90 = vector.shape_cast %87 : vector<4x128xf32> to vector<1x4x128xf32>
    tpu.vector_store %arg5[%c0_59, %c0_60, %c0_61], %90 {strides = array<i32>} : memref<1x4x128xf32, #tpu.memory_space<vmem>>, vector<1x4x128xf32>,
    return
  }
  func.func @transform_0(%arg0: i32, %arg1: i32) -> (i32, i32, i32) {
    %c0_i32 = arith.constant 0 : i32
    %c0_i32_0 = arith.constant 0 : i32
    %c0_i32_1 = arith.constant 0 : i32
    return %arg0, %c0_i32, %c0_i32_0 : i32, i32, i32
  }
  func.func @transform_1(%arg0: i32, %arg1: i32) -> (i32, i32, i32) {
    %c0_i32 = arith.constant 0 : i32
    %c0_i32_0 = arith.constant 0 : i32
    %c0_i32_1 = arith.constant 0 : i32
    %c0_i32_2 = arith.constant 0 : i32
    return %c0_i32, %c0_i32_0, %c0_i32_1 : i32, i32, i32
  }
  func.func @transform_2(%arg0: i32, %arg1: i32) -> (i32, i32, i32) {
    %c0_i32 = arith.constant 0 : i32
    %c0_i32_0 = arith.constant 0 : i32
    return %arg0, %arg1, %c0_i32 : i32, i32, i32
  }
  func.func @transform_3(%arg0: i32, %arg1: i32) -> (i32, i32, i32) {
    %c0_i32 = arith.constant 0 : i32
    %c0_i32_0 = arith.constant 0 : i32
    return %arg0, %arg1, %c0_i32 : i32, i32, i32
  }
  func.func @transform_4(%arg0: i32, %arg1: i32) -> (i32, i32, i32, i32) {
    %c0_i32 = arith.constant 0 : i32
    %c0_i32_0 = arith.constant 0 : i32
    %c0_i32_1 = arith.constant 0 : i32
    return %arg0, %arg1, %c0_i32, %c0_i32_0 : i32, i32, i32, i32
  }
}

</mosaic_0001>

<bundles_post_ra>
// kernel: tpu_custom_call.1
= control target key start
LH: loop header
LB: loop body
LE: loop exit
PB: predicated region body
PF: predicated region fallthrough
CT: control target
= control target key end

     0   :  { %s2056_s0 = inlined_call_operand.vmem [shape: f32[2,24,4], index: 0, kind: input, shape index: {}]   ;;  %s2057_s1 = inlined_call_operand.vmem [shape: f32[9,4,128], index: 1, kind: input, shape index: {}]   ;;  %s2058_s2 = inlined_call_operand.hbm [shape: f32[2,4,128], index: 2, kind: output, shape index: {0}]   ;;  %s2059_s3 = inlined_call_operand.hbm [shape: f32[2,4,128], index: 3, kind: output, shape index: {1}]   ;;  %s2060_s4 = inlined_call_operand.hbm [shape: f32[2,1,2,128], index: 4, kind: output, shape index: {2}]  }
   0x1   :  { %2062 = sst [smem:[#allocation9_spill]] %s2056_s0 }
   0x2   :  { %10 = vsyncpa [#allocation3], 0 }
   0x3   :  { %12 = vsyncpa [#allocation3 + $0x1], 0 }
   0x4   :  { %13 = vsyncpa [#allocation5], 0 }
   0x5   :  { %15 = vsyncpa [#allocation5 + $0x1], 0  ;;  %s1758_s15 = smov 0   ;;  %s1760_s16 = smov 0  }
   0x6   :  { %s1762_s17 = smov 0   ;;  %s1764_s18 = smov 0  }
   0x7   :  { %s1766_s19 = smov 0   ;;  %s1768_s20 = smov 0  }
   0x8 LB: > { %s1368_s21 = sadd.s32 4294967295, %s1728_s20   ;;  %s2061_s22 = sadd.s32 4294967294, %s1728_s20   ;;  %s1728_s20 = sphi %s1768_s20, %s21_s20   ;;  %s1724_s19 = sphi %s1766_s19, %s2073_s19   ;;  %s1720_s18 = sphi %s1764_s18, %s2072_s18   ;;  %s1716_s17 = sphi %s1762_s17, %s2071_s17   ;;  %s1712_s16 = sphi %s1760_s16, %s2070_s16   ;;  %s1708_s15 = sphi %s1758_s15, %s2069_s15  }
   0x9   : > { %s33_s23 = sadd.s32 1, %s1724_s19  ;;  %s89_s24 = sadd.s32 1, %s1716_s17 }
   0xa   : > { %p35_p0 = scmp.ge.s32.totalorder %s33_s23, 2  ;;  %p99_p1 = scmp.ne.s32.totalorder %s1716_s17, %s1712_s16 }
   0xb   : > { %p100_p2 = scmp.eq.s32.totalorder %s1368_s21, 1  ;;  %p105_p3 = scmp.ne.s32.totalorder %s1712_s16, %s1708_s15 }
   0xc   : > { %s2075_s23 = smov (%p35_p0, %s33_s23), 0  ;;  %p106_p5 = scmp.eq.s32.totalorder %s2061_s22, 1 }
   0xd   : > { %p1800_p4 = por %p100_p2, %p99_p1  ;;  %s84_s26 = ssub.s32 %s1724_s19, %s2075_s23 }
   0xe   : > { %p1372_p6 = scmp.ge.s32.totalorder %s1728_s20, 1  ;;  %p87_p7 = scmp.eq.s32.totalorder %s84_s26, 0 }
   0xf   : > { %p1809_p8 = por %p106_p5, %p105_p3  ;;  %p191_p9 = scmp.lt.s32.totalorder %s1728_s20, 3 }
  0x10   : > { %s1815_s28 = scalar_select %p87_p7, %s1716_s17, %s89_s24  }
  0x11   : > { %p192_p10 = pnand %p1372_p6, %p191_p9 }
  0x12   : > { %vm250_vm0 = vcmask (!%p192_p10), 1043456   ;;  %v1400_v0 = vld [vmem:[%s2057_s1 + $0x10] sm:$0xf] (!%p192_p10)  ;;  %v1379_v1 = vld [vmem:[%s2057_s1 + $0x4] sm:$0xf] (!%p192_p10)  ;;  %p227_p11 = scmp.lt.s32.totalorder (!%p192_p10), %s1720_s18, 1 }
  0x13   : > { %195 = sbr.rel (%p192_p10) target bundleno = 361 (0x169), region = 28  ;;  %1483 = vmatprep.subr.msk.mxu0 (!%p192_p10), %vm250_vm0, %v1400_v0  ;;  %1463 = vmatprep.subr.msk.mxu1 (!%p192_p10), %vm250_vm0, %v1379_v1  ;;  %v1406_v2 = vld [vmem:[%s2057_s1 + $0x14] sm:$0xf] (!%p192_p10)  ;;  %v236_v3 = vld [vmem:[%s2057_s1] sm:$0xf] (!%p192_p10)  ;;  %vm243_vm1 = vcmask (!%p192_p10), 31744  }
  0x14   : > { %1484 = vmatpush3.msk.msra.mxu0 (!%p192_p10), %vm250_vm0, %v1400_v0  ;;  %1464 = vmatpush3.msk.msra.mxu1 (!%p192_p10), %vm250_vm0, %v1379_v1  ;;  %s2065_s0 = sld [smem:[#allocation9_spill]] (!%p192_p10)  ;;  %v1412_v10 = vld [vmem:[%s2057_s1 + $0x18] sm:$0xf] (!%p192_p10)  ;;  %v1388_v11 = vld [vmem:[%s2057_s1 + $0x8] sm:$0xf] (!%p192_p10)  ;;  %vm1113_vm2 = vcmask (!%p192_p10), 1041409  }
  0x15   : > { %1488 = vmatprep.subr.msk.mxu0 (!%p192_p10), %vm250_vm0, %v1406_v2  ;;  %1468 = vmatprep.subr.msk.mxu1 (!%p192_p10), %vm250_vm0, %v236_v3  ;;  %v1418_v16 = vld [vmem:[%s2057_s1 + $0x1c] sm:$0xf] (!%p192_p10)  ;;  %v1394_v17 = vld [vmem:[%s2057_s1 + $0xc] sm:$0xf] (!%p192_p10)  ;;  %v1424_v22 = vld [vmem:[%s2057_s1 + $0x20] sm:$0xf] (!%p192_p10) }
  0x16   : > { %vm1115_vm3 = vcmask (!%p192_p10), 1042434   ;;  %vm1117_vm4 = vcmask (!%p192_p10), 1043459   ;;  %s1431_s26 = sshll.u32 (!%p192_p10), %s1720_s18, 6 }
  0x17   : > { %s1933_s8 = scalar_lea.hbm (!%p192_p10), %s2059_s3, %s1431_s26 }
  0x1a   : > { %s228_s11 = scalar_select %p227_p11, %s1720_s18, 1 }
  0x1c   : > { %s1524_s12 = smul.u32 24, %s228_s11  ;;  %s1944_s11 = scalar_lea.hbm %s2058_s2, %s1431_s26 }
  0x1d   : > { %s1730_s26 = smov [#allocation4]  }
  0x1e   : > { %s1840_s24 = scalar_lea.vmem %s2065_s0, %s1524_s12  ;;  %s1913_s12 = sand.u32 1, %s1712_s16  }
  0x1f   : > { %v1377_v4 = vld [vmem:[%s1840_s24 + $0x1] sm:$0xff]  ;;  %v1378_v6 = vld [vmem:[%s1840_s24 + $0x9] sm:$0xff]  ;;  %s1373_s13 = sshll.u32 %s1913_s12, 2  ;;  %s1375_s14 = sshll.u32 %s1913_s12, 1 }
  0x20   : > { %v1398_v5 = vld [vmem:[%s1840_s24 + $0x4] sm:$0xff]  ;;  %1465 = vmatprep.mubr.msk.f32.mxu1 %vm243_vm1, %v1377_v4  ;;  %v1399_v7 = vld [vmem:[%s1840_s24 + $0xc] sm:$0xff]  ;;  %s219_s29 = scalar_lea.vmem [#allocation4], %s1373_s13  ;;  %s1926_s5 = scalar_lea.vmem [#allocation2], %s1373_s13 }
  0x21   : > { %1485 = vmatprep.mubr.msk.f32.mxu0 %vm243_vm1, %v1398_v5  ;;  %v234_v8 = vld [vmem:[%s1840_s24] sm:$0xff]  ;;  %1466 = vmatmul.mubr.msk.f32.vlgmr.msra.gmra.mrb[0].mxu1 %vm243_vm1, %v1378_v6  ;;  %v235_v12 = vld [vmem:[%s1840_s24 + $0x8] sm:$0xff]  ;;  %v1423_v25 = vld [vmem:[%s1840_s24 + $0x10] sm:$0xff]  ;;  %s1197_s30 = sshll.u32 %s219_s29, 4  ;;  %s1183_s6 = sshll.u32 %s1926_s5, 4  ;;  %s1937_s30 = int_to_ptr.vmem [resolvable:$true] %s1197_s30  ;;  %s1946_s6 = int_to_ptr.vmem [resolvable:$true] %s1183_s6 }
  0x22   : > { %v1404_v9 = vld [vmem:[%s1840_s24 + $0x5] sm:$0xff]  ;;  %1486 = vmatmul.mubr.msk.f32.vlgmr.msra.gmra.mrb[0].mxu0 %vm243_vm1, %v1399_v7  ;;  %1469 = vmatpush3.msk.msra.mxu1 %vm250_vm0, %v236_v3  ;;  %v1405_v13 = vld [vmem:[%s1840_s24 + $0xd] sm:$0xff]  ;;  %s1590_s0 = scalar_lea.vmem %s1937_s30, 64  ;;  %s1594_s9 = sshll.u32 %s1730_s26, 4  ;;  %s1595_s9 = int_to_ptr.vmem [resolvable:$false] %s1594_s9 }
  0x23   : > { %1489 = vmatpush3.msk.msra.mxu0 %vm250_vm0, %v1406_v2  ;;  %1470 = vmatprep.mubr.msk.f32.mxu1 %vm243_vm1, %v234_v8  ;;  %v1386_v14 = vld [vmem:[%s1840_s24 + $0x2] sm:$0xff]  ;;  %v1387_v18 = vld [vmem:[%s1840_s24 + $0xa] sm:$0xff]  ;;  %p1591_p12 = scmp.ne.s32.totalorder %s1937_s30, %s1590_s0  ;;  %s1596_s10 = scalar_lea.vmem %s1595_s9, 128 }
  0x24   : > { %1490 = vmatprep.mubr.msk.f32.mxu0 %vm243_vm1, %v1404_v9  ;;  %1493 = vmatprep.subr.msk.mxu0 %vm250_vm0, %v1412_v10  ;;  %v1410_v15 = vld [vmem:[%s1840_s24 + $0x6] sm:$0xff]  ;;  %v1411_v19 = vld [vmem:[%s1840_s24 + $0xe] sm:$0xff]  ;;  %p1597_p1 = scmp.lt.s32.totalorder %s1937_s30, %s1595_s9  ;;  %p1598_p2 = scmp.lt.s32.totalorder %s1596_s10, %s1590_s0 }
  0x25   : > { %1473 = vmatprep.subr.msk.mxu1 %vm250_vm0, %v1388_v11  ;;  %v1392_v20 = vld [vmem:[%s1840_s24 + $0x3] sm:$0xff]  ;;  %v1393_v23 = vld [vmem:[%s1840_s24 + $0xb] sm:$0xff]  ;;  %p1592_p13 = pnand %p1591_p12, %p1800_p4 }
  0x26   : > { %v1416_v21 = vld [vmem:[%s1840_s24 + $0x7] sm:$0xff]  ;;  %v1417_v24 = vld [vmem:[%s1840_s24 + $0xf] sm:$0xff]  ;;  %s1919_s24 = sand.u32 1, %s1368_s21   ;;  %s1952_s21 = scalar_lea.vmem [#allocation6], %s1375_s14 }
  0x27   : > { %s1164_s22 = scalar_lea.sflag [#allocation5], %s1919_s24  ;;  %p1593_p0 = pneg %p1592_p13 }
  0x28   : > { %p1599_p3 = por %p1598_p2, %p1597_p1 }
  0x29   : > { %1471 = vmatmul.mubr.msk.f32.vlgmr.msra.gmra.mrb[0].mxu1 %vm243_vm1, %v235_v12 }
  0x2a   : > { %1491 = vmatmul.mubr.msk.f32.vlgmr.msra.gmra.mrb[0].mxu0 %vm243_vm1, %v1405_v13  ;;  %1474 = vmatpush3.msk.msra.mxu1 %vm250_vm0, %v1388_v11  ;;  %p1600_p5 = pnand %p1599_p3, %p1593_p0 }
  0x2b   : > { %1494 = vmatpush3.msk.msra.mxu0 %vm250_vm0, %v1412_v10  ;;  %1475 = vmatprep.mubr.msk.f32.mxu1 %vm243_vm1, %v1386_v14 }
  0x2c   : > { %1495 = vmatprep.mubr.msk.f32.mxu0 %vm243_vm1, %v1410_v15  ;;  %1498 = vmatprep.subr.msk.mxu0 %vm250_vm0, %v1418_v16 }
  0x2d   : > { %1478 = vmatprep.subr.msk.mxu1 %vm250_vm0, %v1394_v17 }
  0x31   : > { %1476 = vmatmul.mubr.msk.f32.vlgmr.msra.gmra.mrb[0].mxu1 %vm243_vm1, %v1387_v18 }
  0x32   : > { %1496 = vmatmul.mubr.msk.f32.vlgmr.msra.gmra.mrb[0].mxu0 %vm243_vm1, %v1411_v19  ;;  %1479 = vmatpush3.msk.msra.mxu1 %vm250_vm0, %v1394_v17 }
  0x33   : > { %1499 = vmatpush3.msk.msra.mxu0 %vm250_vm0, %v1418_v16  ;;  %1480 = vmatprep.mubr.msk.f32.mxu1 %vm243_vm1, %v1392_v20 }
  0x34   : > { %1500 = vmatprep.mubr.msk.f32.mxu0 %vm243_vm1, %v1416_v21  ;;  %1503 = vmatprep.subr.msk.mxu0 %vm250_vm0, %v1424_v22 }
  0x39   : > { %1481 = vmatmul.mubr.msk.f32.vlgmr.msra.gmra.mrb[0].mxu1 %vm243_vm1, %v1393_v23 }
  0x3a   : > { %1501 = vmatmul.mubr.msk.f32.vlgmr.msra.gmra.mrb[0].mxu0 %vm243_vm1, %v1417_v24 }
  0x3b   : > { %1504 = vmatpush3.msk.msra.mxu0 %vm250_vm0, %v1424_v22  ;;  %1505 = vmatprep.mubr.msk.f32.mxu0 %vm243_vm1, %v235_v12 }
  0x42   : > { %1506 = vmatmul.mubr.msk.f32.vlgmr.msra.gmra.mrb[0].mxu0 %vm243_vm1, %v1423_v25 }
 0x10c   : > { %v1482_v26 = vpop.f32.mrb[0].mxu1 }
 0x10d   : > { %v586_v27 = vpop.f32.mrb[1].mxu1 }
 0x115   : > { %v1507_v28 = vpop.f32.mrb[0].mxu0 }
 0x116   : > { %v1508_v29 = vadd.f32 %v1507_v28, %v1482_v26  ;;  %v1046_v30 = vpop.f32.mrb[1].mxu0 }
 0x117   : > { %v1509_v31 = vadd.f32 %v1046_v30, %v586_v27 }
 0x118   : > { %v1066_v32 = vmul.f32 %v1508_v29, %v1508_v29  ;;  %v1078_v33 = vcombine.high %v1508_v29, %v1508_v29  ;;  %v1095_v34 = vsel %vm250_vm0, %v1508_v29, -inf  ;;  %v1135_v35 = vsel %vm250_vm0, %v1508_v29, inf }
 0x119   : > { %v1096_v36 = vrot.slane %v1095_v34, 4  ;;  %v1136_v37 = vrot.slane %v1135_v35, 4  ;;  %v1057_v38 = vadd.f32 %v1509_v31, %v1508_v29  ;;  %v1065_v39 = vmul.f32 %v1509_v31, %v1509_v31 }
 0x11a   : > { %v1077_v40 = vcombine.high %v1509_v31, %v1509_v31  ;;  %v1081_v41 = vsel %vm250_vm0, %v1509_v31, -inf  ;;  %v1121_v42 = vsel %vm250_vm0, %v1509_v31, inf  ;;  %v1142_v43 = vsel %vm250_vm0, %v1078_v33, inf }
 0x11b   : > { %v1097_v44 = vmax.f32 %v1095_v34, %v1096_v36  ;;  %v1137_v45 = vmin.f32 %v1135_v35, %v1136_v37  ;;  %v1067_v46 = vadd.f32 %v1066_v32, %v1065_v39  ;;  %v1082_v47 = vrot.slane %v1081_v41, 4 }
 0x11c   : > { %v1088_v48 = vsel %vm250_vm0, %v1077_v40, -inf  ;;  %v1122_v49 = vrot.slane %v1121_v42, 4  ;;  %v1128_v50 = vsel %vm250_vm0, %v1077_v40, inf  ;;  %v1143_v54 = vrot.slane %v1142_v43, 4 }
 0x11d   : > { %v1089_v51 = vrot.slane %v1088_v48, 4  ;;  %v1129_v52 = vrot.slane %v1128_v50, 4  ;;  %v1138_v53 = vrot.slane %v1137_v45, 2  ;;  %v1083_v55 = vmax.f32 %v1081_v41, %v1082_v47 }
 0x11e   : > { %v1123_v56 = vmin.f32 %v1121_v42, %v1122_v49  ;;  %v1098_v57 = vrot.slane %v1097_v44, 2  ;;  %v1102_v58 = vsel %vm250_vm0, %v1078_v33, -inf  ;;  %v1144_v62 = vmin.f32 %v1142_v43, %v1143_v54 }
 0x11f   : > { %v1090_v59 = vmax.f32 %v1088_v48, %v1089_v51  ;;  %v1130_v60 = vmin.f32 %v1128_v50, %v1129_v52  ;;  %v1139_v61 = vmin.f32 %v1137_v45, %v1138_v53  ;;  %v1084_v63 = vrot.slane %v1083_v55, 2 }
 0x120   : > { %v1124_v0 = vrot.slane %v1123_v56, 2  ;;  %v1099_v1 = vmax.f32 %v1097_v44, %v1098_v57  ;;  %v1103_v2 = vrot.slane %v1102_v58, 4  ;;  %v1058_v3 = vrot.slane %v1057_v38, 4 }
 0x121   : > { %v1131_v4 = vrot.slane %v1130_v60, 2  ;;  %v1145_v5 = vrot.slane %v1144_v62, 2  ;;  %v1091_v6 = vrot.slane %v1090_v59, 2  ;;  %v1085_v8 = vmax.f32 %v1083_v55, %v1084_v63 }
 0x122   : > { %v1125_v7 = vmin.f32 %v1123_v56, %v1124_v0  ;;  %v1104_v9 = vmax.f32 %v1102_v58, %v1103_v2  ;;  %v1140_v11 = vrot.slane %v1139_v61, 1  ;;  %v1100_v16 = vrot.slane %v1099_v1, 1 }
 0x123   : > { %v1132_v10 = vmin.f32 %v1130_v60, %v1131_v4  ;;  %v1146_v12 = vmin.f32 %v1144_v62, %v1145_v5  ;;  %v1092_v13 = vmax.f32 %v1090_v59, %v1091_v6  ;;  %v1086_v15 = vrot.slane %v1085_v8, 1 }
 0x124   : > { %v1126_v14 = vrot.slane %v1125_v7, 1  ;;  %v1105_v17 = vrot.slane %v1104_v9, 2  ;;  %v1059_v21 = vadd.f32 %v1058_v3, %v1057_v38  ;;  %v1068_v24 = vrot.slane %v1067_v46, 4 }
 0x125   : > { %v1133_v18 = vrot.slane %v1132_v10, 1  ;;  %v1147_v19 = vrot.slane %v1146_v12, 1  ;;  %v1093_v20 = vrot.slane %v1092_v13, 1  ;;  %v1087_v26 = vmax.f32 %v1085_v8, %v1086_v15 }
 0x126   : > { %v1127_v22 = vmin.f32 %v1125_v7, %v1126_v14  ;;  %v1106_v23 = vmax.f32 %v1104_v9, %v1105_v17  ;;  %v1060_v28 = vrot.slane %v1059_v21, 2  ;;  %v1141_v29 = vmin.f32 %v1139_v61, %v1140_v11 }
 0x127   : > { %v1134_v25 = vmin.f32 %v1132_v10, %v1133_v18  ;;  %v1094_v27 = vmax.f32 %v1092_v13, %v1093_v20  ;;  %v1101_v30 = vmax.f32 %v1099_v1, %v1100_v16  ;;  %v1069_v32 = vadd.f32 %v1068_v24, %v1067_v46 }
 0x128   : > { %v1107_v31 = vrot.slane %v1106_v23, 1  ;;  %v1148_v33 = vmin.f32 %v1146_v12, %v1147_v19  ;;  %v1061_v36 = vadd.f32 %v1060_v28, %v1059_v21 }
 0x129   : > { %v1153_v34 = vsel %vm1113_vm2, %v1134_v25, %v1127_v22  ;;  %v1114_v35 = vsel %vm1113_vm2, %v1094_v27, %v1087_v26  ;;  %v1070_v40 = vrot.slane %v1069_v32, 2 }
 0x12a   : > { %v1154_v37 = vsel %vm1115_vm3, %v1141_v29, %v1153_v34  ;;  %v1108_v38 = vmax.f32 %v1106_v23, %v1107_v31  ;;  %v1116_v39 = vsel %vm1115_vm3, %v1101_v30, %v1114_v35  ;;  %v1062_v42 = vrot.slane %v1061_v36, 1 }
 0x12b   : > { %v1155_v41 = vsel %vm1117_vm4, %v1148_v33, %v1154_v37  ;;  %v1071_v44 = vadd.f32 %v1070_v40, %v1069_v32 }
 0x12c   : > { %1157 = vst [vmem:[%s219_s29] sm:$0xf] %v1155_v41  ;;  %v1118_v43 = vsel %vm1117_vm4, %v1108_v38, %v1116_v39 }
 0x12d   : > { %1603 = shalt.err (!%p1600_p5)
}
 0x12e   : > { %s1604_s14 = scalar_lea.hbm %s1933_s8, 64  ;;  %s1608_s26 = scalar_lea.hbm %s2059_s3, 128 }
 0x12f   : > { %p1605_p6 = scmp.ne.s32.totalorder %s1933_s8, %s1604_s14  ;;  %p1609_p10 = scmp.lt.u32.totalorder %s1933_s8, %s2059_s3 }
 0x130   : > { %p1610_p11 = scmp.lt.u32.totalorder %s1608_s26, %s1604_s14  ;;  %p1612_p13 = scmp.lt.u32.totalorder %s1604_s14, %s1933_s8 }
 0x131   : > { %p1606_p7 = pnand %p1605_p6, %p1800_p4 }
 0x132   : > { %p1611_p12 = por %p1610_p11, %p1609_p10 }
 0x133   : > { %p1607_p9 = pneg %p1606_p7 }
 0x134   : > { %p1613_p0 = por %p1612_p13, %p1611_p12 }
 0x136   : > { %p1614_p1 = pnand %p1613_p0, %p1607_p9 }
 0x138   : > { %1617 = shalt.err (!%p1614_p1)
}
 0x139   : > { %1526 = dma.vmem_to_hbm [thread:$0]  (%p1800_p4), %s1937_s30, 64, %s1933_s8, %s1164_s22   ;;  %1120 = vst [vmem:[%s1926_s5] sm:$0xf] %v1118_v43  ;;  %v1063_v45 = vadd.f32 %v1062_v42, %v1061_v36 }
 0x13a   : > { %s1159_s0 = scalar_lea.sflag [#allocation3], %s1913_s12  ;;  %s1618_s13 = scalar_lea.vmem %s1946_s6, 64 }
 0x13b   : > { %p1619_p2 = scmp.ne.s32.totalorder %s1946_s6, %s1618_s13  ;;  %s1731_s7 = smov [#allocation2]  }
 0x13c   : > { %s1622_s10 = sshll.u32 %s1731_s7, 4  ;;  %s1623_s10 = int_to_ptr.vmem [resolvable:$false] %s1622_s10 }
 0x13d   : > { %p1620_p3 = pnand %p1619_p2, %p1800_p4  ;;  %s1624_s14 = scalar_lea.vmem %s1623_s10, 128 }
 0x13e   : > { %p1625_p6 = scmp.lt.s32.totalorder %s1946_s6, %s1623_s10  ;;  %p1626_p7 = scmp.lt.s32.totalorder %s1624_s14, %s1618_s13 }
 0x13f   : > { %p1621_p5 = pneg %p1620_p3 }
 0x140   : > { %p1627_p9 = por %p1626_p7, %p1625_p6 }
 0x142   : > { %p1628_p10 = pnand %p1627_p9, %p1621_p5 }
 0x144   : > { %1631 = shalt.err (!%p1628_p10)
}
 0x145   : > { %s1632_s12 = scalar_lea.hbm %s1944_s11, 64  ;;  %s1636_s8 = scalar_lea.hbm %s2058_s2, 128 }
 0x146   : > { %p1633_p11 = scmp.ne.s32.totalorder %s1944_s11, %s1632_s12  ;;  %p1637_p0 = scmp.lt.u32.totalorder %s1944_s11, %s2058_s2 }
 0x147   : > { %p1638_p1 = scmp.lt.u32.totalorder %s1636_s8, %s1632_s12  ;;  %p1640_p3 = scmp.lt.u32.totalorder %s1632_s12, %s1944_s11 }
 0x148   : > { %p1634_p12 = pnand %p1633_p11, %p1800_p4 }
 0x149   : > { %p1639_p2 = por %p1638_p1, %p1637_p0 }
 0x14a   : > { %p1635_p13 = pneg %p1634_p12 }
 0x14b   : > { %p1641_p5 = por %p1640_p3, %p1639_p2 }
 0x14d   : > { %p1642_p6 = pnand %p1641_p5, %p1635_p13 }
 0x14f   : > { %1645 = shalt.err (!%p1642_p6)
}
 0x150   : > { %1525 = dma.vmem_to_hbm [thread:$0]  (%p1800_p4), %s1946_s6, 64, %s1944_s11, %s1159_s0   ;;  %v1072_v46 = vrot.slane %v1071_v44, 1  ;;  %1064 = vst [vmem:[%s1952_s21] sm:$0x1] %v1063_v45 }
 0x151   : > { %s2066_s9 = sshll.u32 %s1720_s18, 5  ;;  %s2067_s14 = sshll.u32 %s1952_s21, 4  ;;  %s1212_s14 = int_to_ptr.vmem [resolvable:$true] %s2067_s14 }
 0x152   : > { %v1073_v47 = vadd.f32 %v1072_v46, %v1071_v44  ;;  %s2008_s10 = scalar_lea.hbm %s2060_s4, %s2066_s9  ;;  %s1646_s12 = scalar_lea.vmem %s1212_s14, 32 }
 0x153   : > { %p1647_p7 = scmp.ne.s32.totalorder %s1212_s14, %s1646_s12  ;;  %s1732_s30 = smov [#allocation6]  }
 0x154   : > { %1074 = vst [vmem:[%s1952_s21 + $0x1] sm:$0x1] %v1073_v47  ;;  %s1650_s5 = sshll.u32 %s1732_s30, 4  ;;  %s1651_s5 = int_to_ptr.vmem [resolvable:$false] %s1650_s5 }
 0x155   : > { %p1648_p9 = pnand %p1647_p7, %p1800_p4  ;;  %s1652_s6 = scalar_lea.vmem %s1651_s5, 64 }
 0x156   : > { %p1653_p11 = scmp.lt.s32.totalorder %s1212_s14, %s1651_s5  ;;  %p1654_p12 = scmp.lt.s32.totalorder %s1652_s6, %s1646_s12 }
 0x157   : > { %p1649_p10 = pneg %p1648_p9 }
 0x158   : > { %p1655_p13 = por %p1654_p12, %p1653_p11 }
 0x15a   : > { %p1656_p0 = pnand %p1655_p13, %p1649_p10 }
 0x15c   : > { %1659 = shalt.err (!%p1656_p0)
}
 0x15d   : > { %s1660_s18 = scalar_lea.hbm %s2008_s10, 32  ;;  %s1664_s0 = scalar_lea.hbm %s2060_s4, 64 }
 0x15e   : > { %p1661_p1 = scmp.ne.s32.totalorder %s2008_s10, %s1660_s18  ;;  %p1665_p5 = scmp.lt.u32.totalorder %s2008_s10, %s2060_s4 }
 0x15f   : > { %p1666_p6 = scmp.lt.u32.totalorder %s1664_s0, %s1660_s18  ;;  %p1668_p9 = scmp.lt.u32.totalorder %s1660_s18, %s2008_s10 }
 0x160   : > { %p1662_p2 = pnand %p1661_p1, %p1800_p4 }
 0x161   : > { %p1667_p7 = por %p1666_p6, %p1665_p5 }
 0x162   : > { %p1663_p3 = pneg %p1662_p2 }
 0x163   : > { %p1669_p10 = por %p1668_p9, %p1667_p7 }
 0x165   : > { %p1670_p11 = pnand %p1669_p10, %p1663_p3 }
 0x167   : > { %1673 = shalt.err (!%p1670_p11)
}
 0x168   : > { %1527 = dma.vmem_to_hbm [thread:$0]  (%p1800_p4), %s1212_s14, 32, %s2008_s10, %s1164_s22  }
 0x169 PF: > { %p1541_p12 = scmp.ge.s32.totalorder %s1728_s20, 2  ;;  %s1223_s26 = sand.u32 1, %s1708_s15  }
 0x16a   : > { %s1224_s9 = scalar_lea.sflag [#allocation3], %s1223_s26 }
 0x16b   : > { %p1532_p13 = pnand %p1541_p12, %p1809_p8 }
 0x16d   : > { %1699 = dma.done.wait (!%p1532_p13), %s1224_s9, 64  }
 0x16e   : > { %1701 = vsyncadd (!%p1532_p13), %s1224_s9, 4294967232  ;;  %s2068_s13 = sadd.s32 4294967294, %s1728_s20  }
 0x16f   : > { %s1232_s7 = sand.u32 1, %s2068_s13  }
 0x170   : > { %s1233_s12 = scalar_lea.sflag [#allocation5], %s1232_s7 }
 0x171   : > { %1703 = dma.done.wait (!%p1532_p13), %s1233_s12, 96  }
 0x172   : > { %1705 = vsyncadd (!%p1532_p13), %s1233_s12, 4294967200  ;;  %s21_s20 = sadd.s32 1, %s1728_s20   ;;  %s2069_s15 = smov %s1712_s16 }
 0x173   : > { %p18_p4 = scmp.ge.s32.totalorder %s21_s20, 4   ;;  %s2070_s16 = smov %s1716_s17 }
 0x174   : > { %s2071_s17 = smov %s1815_s28  ;;  %s2072_s18 = smov %s1724_s19 }
 0x175   : > { %s2073_s19 = smov %s2075_s23  ;;  %20 = sbr.rel (!%p18_p4) target bundleno = 8 (0x8), region = 112 }
 0x17c   :  { %1247 = vsyncpa [#allocation3], 1 }
 0x17d   :  { %1249 = vsyncpa [#allocation3 + $0x1], 1 }
 0x17e   :  { %1250 = vsyncpa [#allocation5], 1 }
 0x17f   :  { %1252 = vsyncpa [#allocation5 + $0x1], 1 }

</bundles_post_ra>
